<compile_context>
chip_gen: v7x
topology: tpu7x:2x2x1
jax: 0.10.0
libtpu: 0.0.40
codegen_flags: <defaults>
</compile_context>

<pallas_src>
import jax
import jax.numpy as jnp
from jax.experimental import pallas as pl
from jax.experimental.pallas import tpu as pltpu


def _mlp_kernel(x_ref, w_ref, b_ref, o_ref):
    """Fused MLP on a (features, TILE_B) activation tile.

    x_ref : (D_in_pad, TILE_B)        activation tile, batch on lanes
    w_ref : (L, P, P)                 zero-padded weights, PyTorch (out, in) layout
    b_ref : (L, P, 1)                 zero-padded biases (column vectors)
    o_ref : (1, TILE_B)               lane-dense sigmoid output
    """
    n_layers = w_ref.shape[0]
    h = x_ref[...]                                    # (d_in_pad, T)

    # Hidden layers: h <- relu(W_i @ h + b_i).  Zero padding in the slabs makes
    # the padded rows/cols mathematically inert, so only the first layer needs
    # its input-width slice (the input tile is narrower than P).
    for i in range(n_layers - 1):
        w = w_ref[i][:, : h.shape[0]]                 # static value slice
        h = jnp.maximum(
            jnp.dot(w, h, preferred_element_type=jnp.float32) + b_ref[i], 0.0
        )
    # (Dropout(0.5) between layer 1 and 2 -> identity in eval mode.)

    # Final layer has a single output unit: compute it directly as a (1, T)
    # lane-dense row.
    w_last = w_ref[n_layers - 1][0:1, : h.shape[0]]   # (1, P)
    logits = (
        jnp.dot(w_last, h, preferred_element_type=jnp.float32)
        + b_ref[n_layers - 1][0:1, :]
    )                                                 # (1, T)

    # sigmoid: exp and approximate reciprocal both go to the EUP slot.
    o_ref[...] = pl.reciprocal(1.0 + jnp.exp(-logits), approx=True)


def _round_up(n, m):
    return ((n + m - 1) // m) * m


def _pack_params(params):
    """Pack [(W,b), ...] (PyTorch (out,in) layout) into zero-padded slabs."""
    n = len(params)
    p = _round_up(max(max(int(W.shape[0]), int(W.shape[1])) for W, _ in params), 8)
    w_slab = jnp.zeros((n, p, p), jnp.float32)
    b_slab = jnp.zeros((n, p, 1), jnp.float32)
    for i, (W, b) in enumerate(params):
        o, k = W.shape
        w_slab = w_slab.at[i, :o, :k].set(W.astype(jnp.float32))
        b_slab = b_slab.at[i, :o, 0].set(b.astype(jnp.float32))
    return w_slab, b_slab


def feedforward_pallas(x, params, *, tile_b=512):
    """x: (B, D_in) f32; params: list of (W, b) with PyTorch layout W=(out, in)."""
    B, d_in = x.shape
    n_layers = len(params)

    w_slab, b_slab = _pack_params(params)
    p = w_slab.shape[1]

    d_in_pad = _round_up(d_in, 8)
    tile = _round_up(min(tile_b, _round_up(B, 128)), 128)
    b_pad = _round_up(B, tile)
    grid = (b_pad // tile,)

    # Feature-major input: batch goes on the lane axis; zero-pad batch & features.
    x_t = (
        jnp.zeros((d_in_pad, b_pad), jnp.float32)
        .at[:d_in, :B]
        .set(x.astype(jnp.float32).T)
    )

    flops = 2 * b_pad * sum(int(W.shape[0]) * int(W.shape[1]) for W, _ in params)
    bytes_accessed = 4 * (x_t.size + w_slab.size + b_slab.size + b_pad)
    cost = pl.CostEstimate(
        flops=flops, transcendentals=2 * b_pad, bytes_accessed=bytes_accessed
    )

    out = pl.pallas_call(
        _mlp_kernel,
        out_shape=jax.ShapeDtypeStruct((1, b_pad), jnp.float32),
        grid=grid,
        in_specs=[
            # activation tiles: pipelined over the batch grid
            pl.BlockSpec((d_in_pad, tile), lambda i: (0, i)),
            # packed weights / biases: constant block index -> VMEM-resident
            pl.BlockSpec((n_layers, p, p), lambda i: (0, 0, 0)),
            pl.BlockSpec((n_layers, p, 1), lambda i: (0, 0, 0)),
        ],
        out_specs=pl.BlockSpec((1, tile), lambda i: (0, i)),
        compiler_params=pltpu.CompilerParams(
            dimension_semantics=("parallel",),
        ),
        cost_estimate=cost,
    )(x_t, w_slab, b_slab)

    # Lane-dense (1, B_pad) slab -> PyTorch-shaped (B, 1) output.
    return out[0, :B].reshape(B, 1)


def init_params(key, input_size, hidden_sizes):
    """Kaiming-normal weights (fan_in, relu gain) in PyTorch (out, in) layout.

    The PyTorch module zero-initialises biases; we use small random biases here
    so the bias path of the kernel is actually exercised by the check (forward
    semantics are unaffected by the init choice).
    """
    dims = [input_size] + list(hidden_sizes) + [1]
    params = []
    for i in range(len(dims) - 1):
        fan_in, fan_out = dims[i], dims[i + 1]
        key, kw, kb = jax.random.split(key, 3)
        std = (2.0 / fan_in) ** 0.5  # kaiming_normal_, nonlinearity='relu'
        W = std * jax.random.normal(kw, (fan_out, fan_in), dtype=jnp.float32)
        b = 0.1 * jax.random.normal(kb, (fan_out,), dtype=jnp.float32)
        params.append((W, b))
    return params


def reference_forward(x, params):
    h = x
    n = len(params)
    for i, (W, b) in enumerate(params):
        h = h @ W.T + b
        if i < n - 1:
            h = jnp.maximum(h, 0.0)
    return jax.nn.sigmoid(h)


if __name__ == "__main__":
    key = jax.random.PRNGKey(0)
    k_x, k_p = jax.random.split(key)

    input_size = 16
    hidden_sizes = [32, 32, 16, 8]
    params = init_params(k_p, input_size, hidden_sizes)

    # Main check: batch large enough to exercise the batch grid (2 tiles of 512)
    # and the non-multiple-of-tile padding path.
    batch = 1000
    x = jax.random.normal(k_x, (batch, input_size), dtype=jnp.float32)

    out = feedforward_pallas(x, params, tile_b=512)
    out = jax.block_until_ready(out)

    ref = reference_forward(x, params)
    assert out.shape == (batch, 1)
    assert jnp.allclose(out, ref, atol=2e-3, rtol=2e-3), "mismatch vs pure-JAX reference"

    # Tiny-batch path (tile clamps to 128, single grid step).
    x_small = jax.random.normal(jax.random.PRNGKey(1), (8, input_size), dtype=jnp.float32)
    out_small = jax.block_until_ready(feedforward_pallas(x_small, params))
    ref_small = reference_forward(x_small, params)
    assert out_small.shape == (8, 1)
    assert jnp.allclose(out_small, ref_small, atol=2e-3, rtol=2e-3), "small-batch mismatch"

    print("KERNEL_OK")
</pallas_src>

<mosaic_0001>
module attributes {stable_mosaic.version = 11 : i64} {
  func.func @_mlp_kernel(%arg0: i32, %arg1: memref<16x512xf32, #tpu.memory_space<vmem>>, %arg2: memref<5x32x32xf32, #tpu.memory_space<vmem>>, %arg3: memref<5x32x1xf32, #tpu.memory_space<vmem>>, %arg4: memref<1x512xf32, #tpu.memory_space<vmem>>) attributes {dimension_semantics = [#tpu.dimension_semantics<parallel>], iteration_bounds = array<i64: 2>, scalar_prefetch = 0 : i64, scratch_operands = 0 : i64, tpu.core_type = #tpu.core_type<tc>, window_params = [{transform_indices = @transform_0, window_bounds = array<i64: 16, 512>}, {pipeline_mode = #tpu.pipeline_mode<synchronous>, transform_indices = @transform_1, window_bounds = array<i64: 5, 32, 32>}, {pipeline_mode = #tpu.pipeline_mode<synchronous>, transform_indices = @transform_2, window_bounds = array<i64: 5, 32, 1>}, {transform_indices = @transform_3, window_bounds = array<i64: 1, 512>}]} {
    %c0 = arith.constant 0 : index
    %c0_0 = arith.constant 0 : index
    %0 = vector.load %arg1[%c0, %c0_0] : memref<16x512xf32, #tpu.memory_space<vmem>>, vector<16x512xf32>
    %c0_1 = arith.constant 0 : index
    %c0_2 = arith.constant 0 : index
    %c0_3 = arith.constant 0 : index
    %1 = vector.load %arg2[%c0_1, %c0_2, %c0_3] : memref<5x32x32xf32, #tpu.memory_space<vmem>>, vector<1x32x32xf32>
    %2 = vector.shape_cast %1 : vector<1x32x32xf32> to vector<32x32xf32>
    %3 = vector.extract_strided_slice %2 {offsets = [0, 0], sizes = [32, 16], strides = [1, 1]} : vector<32x32xf32> to vector<32x16xf32>
    %cst = arith.constant dense<0.000000e+00> : vector<32x512xf32>
    %4 = tpu.matmul %3, %0, %cst {dimension_numbers = #tpu.dot_dimension_numbers<[1], [0], [0], [1], [0, 0, 1, 1], [], []>} : vector<32x16xf32>, vector<16x512xf32>, vector<32x512xf32> -> vector<32x512xf32>
    %c0_4 = arith.constant 0 : index
    %c0_5 = arith.constant 0 : index
    %c0_6 = arith.constant 0 : index
    %5 = vector.load %arg3[%c0_4, %c0_5, %c0_6] : memref<5x32x1xf32, #tpu.memory_space<vmem>>, vector<1x32x1xf32>
    %6 = vector.shape_cast %5 : vector<1x32x1xf32> to vector<32x1xf32>
    %7 = vector.broadcast %6 : vector<32x1xf32> to vector<32x512xf32>
    %8 = arith.addf %4, %7 : vector<32x512xf32>
    %cst_7 = arith.constant 0.000000e+00 : f32
    %9 = vector.broadcast %cst_7 : f32 to vector<32x512xf32>
    %10 = arith.maximumf %8, %9 : vector<32x512xf32>
    %c1 = arith.constant 1 : index
    %c0_8 = arith.constant 0 : index
    %c0_9 = arith.constant 0 : index
    %11 = vector.load %arg2[%c1, %c0_8, %c0_9] : memref<5x32x32xf32, #tpu.memory_space<vmem>>, vector<1x32x32xf32>
    %12 = vector.shape_cast %11 : vector<1x32x32xf32> to vector<32x32xf32>
    %cst_10 = arith.constant dense<0.000000e+00> : vector<32x512xf32>
    %13 = tpu.matmul %12, %10, %cst_10 {dimension_numbers = #tpu.dot_dimension_numbers<[1], [0], [0], [1], [0, 0, 1, 1], [], []>} : vector<32x32xf32>, vector<32x512xf32>, vector<32x512xf32> -> vector<32x512xf32>
    %c1_11 = arith.constant 1 : index
    %c0_12 = arith.constant 0 : index
    %c0_13 = arith.constant 0 : index
    %14 = vector.load %arg3[%c1_11, %c0_12, %c0_13] : memref<5x32x1xf32, #tpu.memory_space<vmem>>, vector<1x32x1xf32>
    %15 = vector.shape_cast %14 : vector<1x32x1xf32> to vector<32x1xf32>
    %16 = vector.broadcast %15 : vector<32x1xf32> to vector<32x512xf32>
    %17 = arith.addf %13, %16 : vector<32x512xf32>
    %cst_14 = arith.constant 0.000000e+00 : f32
    %18 = vector.broadcast %cst_14 : f32 to vector<32x512xf32>
    %19 = arith.maximumf %17, %18 : vector<32x512xf32>
    %c2 = arith.constant 2 : index
    %c0_15 = arith.constant 0 : index
    %c0_16 = arith.constant 0 : index
    %20 = vector.load %arg2[%c2, %c0_15, %c0_16] : memref<5x32x32xf32, #tpu.memory_space<vmem>>, vector<1x32x32xf32>
    %21 = vector.shape_cast %20 : vector<1x32x32xf32> to vector<32x32xf32>
    %cst_17 = arith.constant dense<0.000000e+00> : vector<32x512xf32>
    %22 = tpu.matmul %21, %19, %cst_17 {dimension_numbers = #tpu.dot_dimension_numbers<[1], [0], [0], [1], [0, 0, 1, 1], [], []>} : vector<32x32xf32>, vector<32x512xf32>, vector<32x512xf32> -> vector<32x512xf32>
    %c2_18 = arith.constant 2 : index
    %c0_19 = arith.constant 0 : index
    %c0_20 = arith.constant 0 : index
    %23 = vector.load %arg3[%c2_18, %c0_19, %c0_20] : memref<5x32x1xf32, #tpu.memory_space<vmem>>, vector<1x32x1xf32>
    %24 = vector.shape_cast %23 : vector<1x32x1xf32> to vector<32x1xf32>
    %25 = vector.broadcast %24 : vector<32x1xf32> to vector<32x512xf32>
    %26 = arith.addf %22, %25 : vector<32x512xf32>
    %cst_21 = arith.constant 0.000000e+00 : f32
    %27 = vector.broadcast %cst_21 : f32 to vector<32x512xf32>
    %28 = arith.maximumf %26, %27 : vector<32x512xf32>
    %c3 = arith.constant 3 : index
    %c0_22 = arith.constant 0 : index
    %c0_23 = arith.constant 0 : index
    %29 = vector.load %arg2[%c3, %c0_22, %c0_23] : memref<5x32x32xf32, #tpu.memory_space<vmem>>, vector<1x32x32xf32>
    %30 = vector.shape_cast %29 : vector<1x32x32xf32> to vector<32x32xf32>
    %cst_24 = arith.constant dense<0.000000e+00> : vector<32x512xf32>
    %31 = tpu.matmul %30, %28, %cst_24 {dimension_numbers = #tpu.dot_dimension_numbers<[1], [0], [0], [1], [0, 0, 1, 1], [], []>} : vector<32x32xf32>, vector<32x512xf32>, vector<32x512xf32> -> vector<32x512xf32>
    %c3_25 = arith.constant 3 : index
    %c0_26 = arith.constant 0 : index
    %c0_27 = arith.constant 0 : index
    %32 = vector.load %arg3[%c3_25, %c0_26, %c0_27] : memref<5x32x1xf32, #tpu.memory_space<vmem>>, vector<1x32x1xf32>
    %33 = vector.shape_cast %32 : vector<1x32x1xf32> to vector<32x1xf32>
    %34 = vector.broadcast %33 : vector<32x1xf32> to vector<32x512xf32>
    %35 = arith.addf %31, %34 : vector<32x512xf32>
    %cst_28 = arith.constant 0.000000e+00 : f32
    %36 = vector.broadcast %cst_28 : f32 to vector<32x512xf32>
    %37 = arith.maximumf %35, %36 : vector<32x512xf32>
    %c4 = arith.constant 4 : index
    %c0_29 = arith.constant 0 : index
    %c0_30 = arith.constant 0 : index
    %38 = vector.load %arg2[%c4, %c0_29, %c0_30] : memref<5x32x32xf32, #tpu.memory_space<vmem>>, vector<1x32x32xf32>
    %39 = vector.shape_cast %38 : vector<1x32x32xf32> to vector<32x32xf32>
    %40 = vector.extract_strided_slice %39 {offsets = [0, 0], sizes = [1, 32], strides = [1, 1]} : vector<32x32xf32> to vector<1x32xf32>
    %cst_31 = arith.constant dense<0.000000e+00> : vector<1x512xf32>
    %41 = tpu.matmul %40, %37, %cst_31 {dimension_numbers = #tpu.dot_dimension_numbers<[1], [0], [0], [1], [0, 0, 1, 1], [], []>} : vector<1x32xf32>, vector<32x512xf32>, vector<1x512xf32> -> vector<1x512xf32>
    %c4_32 = arith.constant 4 : index
    %c0_33 = arith.constant 0 : index
    %c0_34 = arith.constant 0 : index
    %42 = vector.load %arg3[%c4_32, %c0_33, %c0_34] : memref<5x32x1xf32, #tpu.memory_space<vmem>>, vector<1x32x1xf32>
    %43 = vector.shape_cast %42 : vector<1x32x1xf32> to vector<32x1xf32>
    %44 = vector.extract_strided_slice %43 {offsets = [0, 0], sizes = [1, 1], strides = [1, 1]} : vector<32x1xf32> to vector<1x1xf32>
    %45 = vector.broadcast %44 : vector<1x1xf32> to vector<1x512xf32>
    %46 = arith.addf %41, %45 : vector<1x512xf32>
    %cst_35 = arith.constant 0.000000e+00 : f32
    %47 = vector.broadcast %cst_35 : f32 to vector<1x512xf32>
    %48 = arith.subf %47, %46 : vector<1x512xf32>
    %49 = math.exp %48 : vector<1x512xf32>
    %cst_36 = arith.constant 1.000000e+00 : f32
    %50 = vector.broadcast %cst_36 : f32 to vector<1x512xf32>
    %51 = arith.addf %50, %49 : vector<1x512xf32>
    %52 = tpu.reciprocal %51 {approx = true} : vector<1x512xf32> -> vector<1x512xf32>
    %c0_37 = arith.constant 0 : index
    %c0_38 = arith.constant 0 : index
    %53 = vector.load %arg4[%c0_37, %c0_38] : memref<1x512xf32, #tpu.memory_space<vmem>>, vector<1x512xf32>
    tpu.vector_store %arg4[%c0_37, %c0_38], %52 {strides = array<i32>} : memref<1x512xf32, #tpu.memory_space<vmem>>, vector<1x512xf32>,
    return
  }
  func.func @transform_0(%arg0: i32) -> (i32, i32) {
    %c0_i32 = arith.constant 0 : i32
    %c0_i32_0 = arith.constant 0 : i32
    return %c0_i32, %arg0 : i32, i32
  }
  func.func @transform_1(%arg0: i32) -> (i32, i32, i32) {
    %c0_i32 = arith.constant 0 : i32
    %c0_i32_0 = arith.constant 0 : i32
    %c0_i32_1 = arith.constant 0 : i32
    %c0_i32_2 = arith.constant 0 : i32
    return %c0_i32, %c0_i32_0, %c0_i32_1 : i32, i32, i32
  }
  func.func @transform_2(%arg0: i32) -> (i32, i32, i32) {
    %c0_i32 = arith.constant 0 : i32
    %c0_i32_0 = arith.constant 0 : i32
    %c0_i32_1 = arith.constant 0 : i32
    %c0_i32_2 = arith.constant 0 : i32
    return %c0_i32, %c0_i32_0, %c0_i32_1 : i32, i32, i32
  }
  func.func @transform_3(%arg0: i32) -> (i32, i32) {
    %c0_i32 = arith.constant 0 : i32
    %c0_i32_0 = arith.constant 0 : i32
    return %c0_i32, %arg0 : i32, i32
  }
}

</mosaic_0001>

<bundles_post_ra>
// kernel: tpu_custom_call.1
= control target key start
LH: loop header
LB: loop body
LE: loop exit
PB: predicated region body
PF: predicated region fallthrough
CT: control target
= control target key end

     0   :  { %8 = vsyncpa [#allocation3], 0  ;;  %s2113_s0 = inlined_call_operand.hbm [shape: f32[16,1024], index: 0, kind: input, shape index: {}]   ;;  %s2114_s1 = inlined_call_operand.vmem [shape: f32[5,32,32], index: 1, kind: input, shape index: {}]   ;;  %s2115_s2 = inlined_call_operand.vmem [shape: f32[5,32,1], index: 2, kind: input, shape index: {}]   ;;  %s2116_s3 = inlined_call_operand.hbm [shape: f32[1,1024], index: 3, kind: output, shape index: {}]  }
   0x1   :  { %10 = vsyncpa [#allocation3 + $0x1], 0 }
   0x2   :  { %11 = vsyncpa [#allocation4], 0 }
   0x3   :  { %13 = vsyncpa [#allocation4 + $0x1], 0  ;;  %s1780_s12 = smov 0   ;;  %s1782_s13 = smov 0  }
   0x4   :  { %s1784_s14 = smov 0   ;;  %s1786_s15 = smov 0  }
   0x5 LB: > { %s1801_s16 = sadd.s32 4294967295, %s1750_s15   ;;  %s1436_s17 = sadd.s32 4294967294, %s1750_s15   ;;  %s1750_s15 = sphi %s1786_s15, %s2130_s15   ;;  %s1746_s14 = sphi %s1784_s14, %s2129_s14   ;;  %s1742_s13 = sphi %s1782_s13, %s2128_s13   ;;  %s1738_s12 = sphi %s1780_s12, %s2127_s12  }
   0x6   : > { %s1805_s18 = sadd.s32 1, %s1750_s15   ;;  %s26_s19 = sadd.s32 1, %s1746_s14 }
   0x7   : > { %s23_s20 = ssub.s32 %s1750_s15, %s1805_s18  ;;  %p33_p0 = scmp.ne.s32.totalorder %s1746_s14, %s1742_s13 }
   0x8   : > { %p24_p1 = scmp.eq.s32.totalorder %s23_s20, 0  ;;  %p34_p2 = scmp.eq.s32.totalorder %s1750_s15, 0 }
   0x9   : > { %p39_p3 = scmp.ne.s32.totalorder %s1742_s13, %s1738_s12  ;;  %p40_p4 = scmp.eq.s32.totalorder %s1801_s16, 0 }
   0xa   : > { %s1817_s21 = scalar_select %p24_p1, %s1746_s14, %s26_s19  }
   0xb   : > { %p1819_p5 = por %p34_p2, %p33_p0  ;;  %p1823_p6 = por %p40_p4, %p39_p3 }
   0xc   : > { %p105_p7 = scmp.eq.s32.totalorder %s1801_s16, 1  ;;  %p111_p8 = scmp.eq.s32.totalorder %s1436_s17, 1 }
   0xd   : > { %p1596_p10 = scmp.lt.s32.totalorder %s1750_s15, 2  ;;  %s137_s26 = sand.u32 1, %s1746_s14  }
   0xe   : > { %p1830_p11 = por %p105_p7, %p33_p0  ;;  %p1834_p12 = por %p111_p8, %p39_p3 }
   0xf   : > { %s1510_s27 = sshll.u32 %s1750_s15, 9  ;;  %s1439_s28 = sshll.u32 %s137_s26, 6 }
  0x10   : > { %s2120_s24 = scalar_select %p1830_p11, 1, 0 }
  0x11   : > { %s2121_s25 = scalar_select %p1834_p12, 1, 0 }
  0x12   : > { %s1843_s4 = scalar_lea.hbm %s2113_s0, %s1510_s27  ;;  %s141_s5 = scalar_lea.vmem [#allocation2], %s1439_s28 }
  0x13   : > { %s148_s6 = sshll.u32 %s141_s5, 4  ;;  %p1847_p13 = pnand %p1596_p10, %p1819_p5  ;;  %s1851_s6 = int_to_ptr.vmem [resolvable:$true] %s148_s6 }
  0x14   : > { %s1854_s8 = scalar_lea.sflag [#allocation3], %s137_s26  ;;  %s1654_s9 = scalar_lea.hbm %s1843_s4, 1024 }
  0x15   : > { %p1655_p1 = scmp.ne.s32.totalorder %s1843_s4, %s1654_s9  ;;  %p1656_p2 = pneg %p1847_p13 }
  0x16   : > { %s1659_s17 = scalar_lea.hbm %s2113_s0, 2048  ;;  %p1660_p5 = scmp.lt.u32.totalorder %s1843_s4, %s2113_s0 }
  0x17   : > { %p1657_p3 = pnand %p1656_p2, %p1655_p1  ;;  %p1661_p7 = scmp.lt.u32.totalorder %s1659_s17, %s1654_s9 }
  0x18   : > { %p1663_p10 = scmp.lt.u32.totalorder %s1654_s9, %s1843_s4 }
  0x19   : > { %p1658_p4 = pneg %p1657_p3  ;;  %p1662_p8 = por %p1661_p7, %p1660_p5 }
  0x1b   : > { %p1664_p9 = por %p1663_p10, %p1662_p8 }
  0x1d   : > { %p1665_p0 = pnand %p1664_p9, %p1658_p4 }
  0x1f   : > { %1668 = shalt.err (!%p1665_p0)
}
  0x20   : > { %s1669_s22 = scalar_lea.vmem %s1851_s6, 1024  ;;  %s1752_s26 = smov [#allocation2]  }
  0x21   : > { %p1670_p1 = scmp.ne.s32.totalorder %s1851_s6, %s1669_s22  ;;  %s1674_s27 = sshll.u32 %s1752_s26, 4  ;;  %s1675_s27 = int_to_ptr.vmem [resolvable:$false] %s1674_s27 }
  0x22   : > { %s1676_s28 = scalar_lea.vmem %s1675_s27, 2048  ;;  %p1677_p11 = scmp.lt.s32.totalorder %s1851_s6, %s1675_s27 }
  0x23   : > { %p1672_p3 = pnand %p1670_p1, %p1656_p2  ;;  %p1678_p5 = scmp.lt.s32.totalorder %s1676_s28, %s1669_s22 }
  0x25   : > { %p1673_p12 = pneg %p1672_p3  ;;  %p1679_p7 = por %p1678_p5, %p1677_p11 }
  0x27   : > { %p1680_p8 = pnand %p1679_p7, %p1673_p12 }
  0x29   : > { %1683 = shalt.err (!%p1680_p8)
}
  0x2a   : > { %s1753_s29 = smov 1024   ;;  %s1754_s30 = smov 512  }
  0x2b   : > { %s1755_s5 = smov 32   ;;  %p156_p9 = scmp.lt.s32.totalorder %s1750_s15, 3 }
  0x2c   : > { %1591 = dma.hbm_to_vmem [thread:$0]  (!%p1847_p13), %s1843_s4, 1024, %s1851_s6, %s1854_s8, %s1753_s29, %s1754_s30, %s1755_s5  }
  0x2d   : > { %p2123_p0 = scmp.ge.s32.totalorder %s1750_s15, 1 }
  0x2f   : > { %p157_p2 = pnand %p2123_p0, %p156_p9 }
  0x30   : > { %s1886_s9 = sand.u32 (!%p157_p2), 1, %s1742_s13  }
  0x31   : > { %160 = sbr.rel (%p157_p2) target bundleno = 1272 (0x4f8), region = 32  ;;  %s1443_s10 = sshll.u32 (!%p157_p2), %s1886_s9, 6 }
  0x32   : > { %s163_s11 = scalar_lea.sflag (!%p157_p2), [#allocation3], %s1886_s9  ;;  %s166_s17 = scalar_lea.vmem (!%p157_p2), [#allocation2], %s1443_s10 }
  0x38   : > { %1729 = dma.done.wait (%p1823_p6), %s163_s11, 1024  }
  0x39   : > { %1731 = vsyncadd (%p1823_p6), %s163_s11, 4294966272  ;;  %v1756_v0 = vmov 0.0   ;;  %v1757_v1 = vmov 0   ;;  %v192_v2 = vld [vmem:[%s166_s17 + $0x8] sm:$0xff]  ;;  %v194_v4 = vld [vmem:[%s166_s17 + $0x18] sm:$0xff]  ;;  %vm227_vm0 = vcmask 130048  }
  0x3a   : > { %304 = vmatprep.mubr.f32.mxu0 %v1756_v0  ;;  %393 = vmatprep.mubr.f32.mxu1 %v1756_v0  ;;  %v196_v3 = vld [vmem:[%s166_s17 + $0x28] sm:$0xff]  ;;  %v198_v6 = vld [vmem:[%s166_s17 + $0x38] sm:$0xff]  ;;  %v191_v7 = vld [vmem:[%s166_s17] sm:$0xff]  ;;  %vm464_vm1 = vcmask 261120   ;;  %s1444_s23 = sshll.u32 %s1886_s9, 2  ;;  %s1511_s4 = sshll.u32 %s1801_s16, 6 }
  0x3b   : > { %1636 = vset.pattern.permute.xlu0 %v1757_v1  ;;  %1637 = vset.pattern.permute.xlu1 %v1757_v1  ;;  %v1512_v5 = vpack.c.bf16 %v196_v3, %v192_v2  ;;  %v195_v8 = vld [vmem:[%s166_s17 + $0x20] sm:$0xff]  ;;  %v1516_v9 = vpack.c.bf16 %v198_v6, %v194_v4  ;;  %v193_v11 = vld [vmem:[%s166_s17 + $0x10] sm:$0xff]  ;;  %v204_v17 = vld [vmem:[%s2115_s2 + $0x8] sm:$0xff]  ;;  %s188_s6 = scalar_lea.vmem [#allocation5], %s1444_s23  ;;  %s2069_s20 = scalar_lea.hbm %s2116_s3, %s1511_s4 }
  0x3c   : > { %v1514_v10 = vpack.c.bf16 %v195_v8, %v191_v7  ;;  %v197_v12 = vld [vmem:[%s166_s17 + $0x30] sm:$0xff]  ;;  %v199_v14 = vld [vmem:[%s2114_s1] sm:$0xff]  ;;  %v206_v18 = vld [vmem:[%s2115_s2 + $0x18] sm:$0xff]  ;;  %s1366_s7 = sshll.u32 %s188_s6, 4  ;;  %s1352_s22 = scalar_lea.sflag [#allocation4], %s1886_s9  ;;  %s2071_s7 = int_to_ptr.vmem [resolvable:$true] %s1366_s7 }
  0x3d   : > { %1513 = vmatprep.subr.bf16.mxu0 %v1512_v5  ;;  %v1518_v13 = vpack.c.bf16 %v197_v12, %v193_v11  ;;  %1517 = vmatprep.subr.bf16.mxu1 %v1516_v9  ;;  %v203_v15 = vld [vmem:[%s2115_s2] sm:$0xff]  ;;  %v205_v16 = vld [vmem:[%s2115_s2 + $0x10] sm:$0xff]  ;;  %v200_v19 = vld [vmem:[%s2114_s1 + $0x8] sm:$0xff]  ;;  %s1684_s26 = scalar_lea.vmem %s2071_s7, 64  ;;  %p2124_p11 = scmp.ne.s32.totalorder %s2120_s24, 0 }
  0x3e   : > { %1515 = vmatpush1.bf16.msra.mxu0 %v1514_v10  ;;  %209 = vperm.xlu0 %1636, %v203_v15   ;;  %v1457_v20 = vld [vmem:[%s2115_s2 + $0x20] sm:$0xff]  ;;  %v1458_v21 = vld [vmem:[%s2115_s2 + $0x28] sm:$0xff]  ;;  %v201_v22 = vld [vmem:[%s2114_s1 + $0x10] sm:$0xff]  ;;  %p1685_p6 = scmp.ne.s32.totalorder %s2071_s7, %s1684_s26  ;;  %s1759_s16 = smov [#allocation5]  }
  0x3f   : > { %1519 = vmatpush1.bf16.msra.mxu1 %v1518_v13  ;;  %219 = vperm.xlu1 %1637, %v205_v16   ;;  %v1459_v23 = vld [vmem:[%s2115_s2 + $0x30] sm:$0xff]  ;;  %v1460_v24 = vld [vmem:[%s2115_s2 + $0x38] sm:$0xff]  ;;  %v1473_v26 = vld [vmem:[%s2115_s2 + $0x40] sm:$0xff]  ;;  %s1688_s27 = sshll.u32 %s1759_s16, 4  ;;  %s1689_s27 = int_to_ptr.vmem [resolvable:$false] %s1688_s27 }
  0x40   : > { %v202_v25 = vld [vmem:[%s2114_s1 + $0x18] sm:$0xff]  ;;  %v1474_v27 = vld [vmem:[%s2115_s2 + $0x48] sm:$0xff]  ;;  %v1475_v28 = vld [vmem:[%s2115_s2 + $0x50] sm:$0xff]  ;;  %p1686_p12 = pnand %p1685_p6, %p2124_p11  ;;  %s1690_s28 = scalar_lea.vmem %s1689_s27, 128 }
  0x41   : > { %1445 = vmatmul.mubr.msk.f32.vlgmr.msra.gmra.mrb[0].mxu0 %vm227_vm0, %v199_v14  ;;  %v1476_v29 = vld [vmem:[%s2115_s2 + $0x58] sm:$0xff]  ;;  %v1489_v30 = vld [vmem:[%s2115_s2 + $0x60] sm:$0xff]  ;;  %v1490_v31 = vld [vmem:[%s2115_s2 + $0x68] sm:$0xff]  ;;  %p1691_p4 = scmp.lt.s32.totalorder %s2071_s7, %s1689_s27  ;;  %p1692_p10 = scmp.lt.s32.totalorder %s1690_s28, %s1684_s26 }
  0x42   : > { %1449 = vmatmul.mubr.msk.f32.vlgmr.msra.gmra.mrb[0].mxu1 %vm227_vm0, %v199_v14  ;;  %310 = vmatprep.mubr.f32.mxu0 %v1756_v0  ;;  %v1491_v32 = vld [vmem:[%s2115_s2 + $0x70] sm:$0xff]  ;;  %v1492_v33 = vld [vmem:[%s2115_s2 + $0x78] sm:$0xff]  ;;  %v1502_v34 = vld [vmem:[%s2115_s2 + $0x80] sm:$0xff]  ;;  %p1687_p13 = pneg %p1686_p12 }
  0x43   : > { %399 = vmatprep.mubr.f32.mxu1 %v1756_v0  ;;  %214 = vperm.xlu0 %1636, %v204_v17   ;;  %p1693_p1 = por %p1692_p10, %p1691_p4 }
  0x44   : > { %224 = vperm.xlu1 %1637, %v206_v18  }
  0x45   : > { %1446 = vmatmul.mubr.msk.f32.gmra.mrb[2].mxu0 %vm227_vm0, %v200_v19  ;;  %p1694_p3 = pnand %p1693_p1, %p1687_p13 }
  0x46   : > { %1450 = vmatmul.mubr.msk.f32.gmra.mrb[2].mxu1 %vm227_vm0, %v200_v19  ;;  %316 = vmatprep.mubr.f32.mxu0 %v1756_v0 }
  0x47   : > { %405 = vmatprep.mubr.f32.mxu1 %v1756_v0  ;;  %446 = vperm.xlu0 %1636, %v1457_v20  }
  0x48   : > { %451 = vperm.xlu1 %1637, %v1458_v21  }
  0x49   : > { %1447 = vmatmul.mubr.msk.f32.gmra.mrb[4].mxu0 %vm227_vm0, %v201_v22 }
  0x4a   : > { %1451 = vmatmul.mubr.msk.f32.gmra.mrb[4].mxu1 %vm227_vm0, %v201_v22  ;;  %322 = vmatprep.mubr.f32.mxu0 %v1756_v0 }
  0x4b   : > { %411 = vmatprep.mubr.f32.mxu1 %v1756_v0  ;;  %456 = vperm.xlu0 %1636, %v1459_v23  }
  0x4c   : > { %461 = vperm.xlu1 %1637, %v1460_v24  }
  0x4d   : > { %1448 = vmatmul.mubr.msk.f32.gmra.mrb[6].mxu0 %vm227_vm0, %v202_v25 }
  0x4e   : > { %1452 = vmatmul.mubr.msk.f32.gmra.mrb[6].mxu1 %vm227_vm0, %v202_v25  ;;  %541 = vmatprep.mubr.f32.mxu0 %v1756_v0 }
  0x4f   : > { %683 = vperm.xlu0 %1636, %v1473_v26   ;;  %630 = vmatprep.mubr.f32.mxu1 %v1756_v0 }
  0x50   : > { %688 = vperm.xlu1 %1637, %v1474_v27  }
  0x53   : > { %693 = vperm.xlu0 %1636, %v1475_v28  }
  0x54   : > { %698 = vperm.xlu1 %1637, %v1476_v29  }
  0x57   : > { %919 = vperm.xlu0 %1636, %v1489_v30  }
  0x58   : > { %924 = vperm.xlu1 %1637, %v1490_v31  }
  0x5b   : > { %929 = vperm.xlu0 %1636, %v1491_v32   ;;  %v1453_v32 = vld [vmem:[%s2114_s1 + $0x20] sm:$0xff] }
  0x5c   : > { %934 = vperm.xlu1 %1637, %v1492_v33   ;;  %v1454_v33 = vld [vmem:[%s2114_s1 + $0x28] sm:$0xff] }
  0x5f   : > { %1149 = vperm.xlu0 %1636, %v1502_v34   ;;  %v1455_v34 = vld [vmem:[%s2114_s1 + $0x30] sm:$0xff] }
  0xbd   : > { %v210_v35 = vpop.permute.xlu0 %209 }
  0xbe   : > { %v220_v49 = vpop.permute.xlu1 %219 }
  0xc2   : > { %v215_v41 = vpop.permute.xlu0 %214 }
  0xc3   : > { %v225_v8 = vpop.permute.xlu1 %224 }
 0x114   : > { %v306_v36 = vpop.f32.mrb[0].mxu0 }
 0x115   : > { %v395_v37 = vpop.f32.mrb[0].mxu1  ;;  %v308_v38 = vpop.f32.mrb[1].mxu0  ;;  %v307_v40 = vadd.f32 %v306_v36, %v210_v35 }
 0x116   : > { %v397_v39 = vpop.f32.mrb[1].mxu1  ;;  %v396_v42 = vadd.f32 %v395_v37, %v210_v35  ;;  %v309_v43 = vadd.f32 %v308_v38, %v210_v35 }
 0x117   : > { %v398_v45 = vadd.f32 %v397_v39, %v210_v35  ;;  %v418_v53 = vmax.f32 %v307_v40, 0.0  ;;  %v1456_v35 = vld [vmem:[%s2114_s1 + $0x38] sm:$0xff]  ;;  %v447_v39 = vpop.permute.xlu0 %446 }
 0x118   : > { %v312_v44 = vpop.f32.mrb[2].mxu0  ;;  %v420_v56 = vmax.f32 %v396_v42, 0.0  ;;  %v419_v57 = vmax.f32 %v309_v43, 0.0  ;;  %v452_v42 = vpop.permute.xlu1 %451 }
 0x119   : > { %v313_v46 = vadd.f32 %v312_v44, %v215_v41  ;;  %v401_v47 = vpop.f32.mrb[2].mxu1  ;;  %v314_v48 = vpop.f32.mrb[3].mxu0  ;;  %v421_v61 = vmax.f32 %v398_v45, 0.0 }
 0x11a   : > { %v402_v50 = vadd.f32 %v401_v47, %v215_v41  ;;  %v315_v51 = vadd.f32 %v314_v48, %v215_v41  ;;  %v403_v52 = vpop.f32.mrb[3].mxu1 }
 0x11b   : > { %v422_v54 = vmax.f32 %v313_v46, 0.0  ;;  %v404_v55 = vadd.f32 %v403_v52, %v215_v41 }
 0x11c   : > { %v424_v58 = vmax.f32 %v402_v50, 0.0  ;;  %v423_v59 = vmax.f32 %v315_v51, 0.0  ;;  %v318_v60 = vpop.f32.mrb[4].mxu0 }
 0x11d   : > { %v1522_v62 = vpack.c.bf16 %v422_v54, %v418_v53  ;;  %v425_v63 = vmax.f32 %v404_v55, 0.0  ;;  %v407_v1 = vpop.f32.mrb[4].mxu1  ;;  %v320_v2 = vpop.f32.mrb[5].mxu0  ;;  %v319_v7 = vadd.f32 %v318_v60, %v220_v49 }
 0x11e   : > { %v1530_v3 = vpack.c.bf16 %v424_v58, %v420_v56  ;;  %v1520_v4 = vpack.c.bf16 %v423_v59, %v419_v57  ;;  %v409_v5 = vpop.f32.mrb[5].mxu1  ;;  %v408_v9 = vadd.f32 %v407_v1, %v220_v49  ;;  %v321_v10 = vadd.f32 %v320_v2, %v220_v49 }
 0x11f   : > { %v1528_v6 = vpack.c.bf16 %v425_v63, %v421_v61  ;;  %v410_v12 = vadd.f32 %v409_v5, %v220_v49  ;;  %v426_v19 = vmax.f32 %v319_v7, 0.0 }
 0x120   : > { %v324_v11 = vpop.f32.mrb[6].mxu0  ;;  %1521 = vmatprep.subr.bf16.mxu0 %v1520_v4  ;;  %v428_v22 = vmax.f32 %v408_v9, 0.0  ;;  %v427_v23 = vmax.f32 %v321_v10, 0.0  ;;  %v462_v9 = vpop.permute.xlu1 %461 }
 0x121   : > { %v325_v13 = vadd.f32 %v324_v11, %v225_v8  ;;  %v413_v14 = vpop.f32.mrb[6].mxu1  ;;  %1529 = vmatprep.subr.bf16.mxu1 %v1528_v6  ;;  %v326_v15 = vpop.f32.mrb[7].mxu0  ;;  %1523 = vmatpush1.bf16.msra.mxu0 %v1522_v62  ;;  %v429_v26 = vmax.f32 %v410_v12, 0.0 }
 0x122   : > { %v414_v16 = vadd.f32 %v413_v14, %v225_v8  ;;  %v327_v17 = vadd.f32 %v326_v15, %v225_v8  ;;  %v415_v18 = vpop.f32.mrb[7].mxu1  ;;  %1531 = vmatpush1.bf16.msra.mxu1 %v1530_v3  ;;  %v457_v3 = vpop.permute.xlu0 %456 }
 0x123   : > { %v430_v20 = vmax.f32 %v325_v13, 0.0  ;;  %v416_v21 = vadd.f32 %v415_v18, %v225_v8 }
 0x124   : > { %v432_v24 = vmax.f32 %v414_v16, 0.0  ;;  %v431_v25 = vmax.f32 %v327_v17, 0.0 }
 0x125   : > { %v1526_v27 = vpack.c.bf16 %v430_v20, %v426_v19  ;;  %v433_v28 = vmax.f32 %v416_v21, 0.0 }
 0x126   : > { %v1534_v29 = vpack.c.bf16 %v432_v24, %v428_v22  ;;  %v1524_v30 = vpack.c.bf16 %v431_v25, %v427_v23 }
 0x127   : > { %v1532_v31 = vpack.c.bf16 %v433_v28, %v429_v26 }
 0x128   : > { %1525 = vmatprep.subr.bf16.mxu0 %v1524_v30 }
 0x129   : > { %1533 = vmatprep.subr.bf16.mxu1 %v1532_v31  ;;  %1527 = vmatpush1.bf16.msra.mxu0 %v1526_v27 }
 0x12a   : > { %1535 = vmatpush1.bf16.msra.mxu1 %v1534_v29 }
 0x12c   : > { %1461 = vmatmul.mubr.msk.f32.vlgmr.msra.gmra.mrb[8].mxu0 %vm464_vm1, %v1453_v32 }
 0x12d   : > { %1465 = vmatmul.mubr.msk.f32.vlgmr.msra.gmra.mrb[8].mxu1 %vm464_vm1, %v1453_v32  ;;  %547 = vmatprep.mubr.f32.mxu0 %v1756_v0 }
 0x12e   : > { %636 = vmatprep.mubr.f32.mxu1 %v1756_v0 }
 0x130   : > { %1462 = vmatmul.mubr.msk.f32.gmra.mrb[10].mxu0 %vm464_vm1, %v1454_v33 }
 0x131   : > { %1466 = vmatmul.mubr.msk.f32.gmra.mrb[10].mxu1 %vm464_vm1, %v1454_v33  ;;  %553 = vmatprep.mubr.f32.mxu0 %v1756_v0  ;;  %v1469_v33 = vld [vmem:[%s2114_s1 + $0x40] sm:$0xff] }
 0x132   : > { %642 = vmatprep.mubr.f32.mxu1 %v1756_v0 }
 0x134   : > { %1463 = vmatmul.mubr.msk.f32.gmra.mrb[12].mxu0 %vm464_vm1, %v1455_v34 }
 0x135   : > { %1467 = vmatmul.mubr.msk.f32.gmra.mrb[12].mxu1 %vm464_vm1, %v1455_v34  ;;  %559 = vmatprep.mubr.f32.mxu0 %v1756_v0  ;;  %v1470_v34 = vld [vmem:[%s2114_s1 + $0x48] sm:$0xff] }
 0x136   : > { %648 = vmatprep.mubr.f32.mxu1 %v1756_v0 }
 0x138   : > { %1464 = vmatmul.mubr.msk.f32.gmra.mrb[14].mxu0 %vm464_vm1, %v1456_v35 }
 0x139   : > { %1468 = vmatmul.mubr.msk.f32.gmra.mrb[14].mxu1 %vm464_vm1, %v1456_v35  ;;  %777 = vmatprep.mubr.f32.mxu0 %v1756_v0  ;;  %v1471_v35 = vld [vmem:[%s2114_s1 + $0x50] sm:$0xff] }
 0x13a   : > { %866 = vmatprep.mubr.f32.mxu1 %v1756_v0 }
 0x1ff   : > { %v543_v36 = vpop.f32.mrb[8].mxu0 }
 0x200   : > { %v632_v37 = vpop.f32.mrb[8].mxu1  ;;  %v545_v38 = vpop.f32.mrb[9].mxu0  ;;  %v544_v41 = vadd.f32 %v543_v36, %v447_v39  ;;  %v1472_v36 = vld [vmem:[%s2114_s1 + $0x58] sm:$0xff] }
 0x201   : > { %v634_v40 = vpop.f32.mrb[9].mxu1  ;;  %v633_v43 = vadd.f32 %v632_v37, %v447_v39  ;;  %v546_v44 = vadd.f32 %v545_v38, %v447_v39 }
 0x202   : > { %v635_v46 = vadd.f32 %v634_v40, %v447_v39  ;;  %v655_v53 = vmax.f32 %v544_v41, 0.0  ;;  %v684_v40 = vpop.permute.xlu0 %683 }
 0x203   : > { %v549_v45 = vpop.f32.mrb[10].mxu0  ;;  %v657_v56 = vmax.f32 %v633_v43, 0.0  ;;  %v656_v57 = vmax.f32 %v546_v44, 0.0  ;;  %v689_v43 = vpop.permute.xlu1 %688 }
 0x204   : > { %v550_v47 = vadd.f32 %v549_v45, %v452_v42  ;;  %v638_v48 = vpop.f32.mrb[10].mxu1  ;;  %v551_v49 = vpop.f32.mrb[11].mxu0  ;;  %v658_v61 = vmax.f32 %v635_v46, 0.0 }
 0x205   : > { %v639_v50 = vadd.f32 %v638_v48, %v452_v42  ;;  %v552_v51 = vadd.f32 %v551_v49, %v452_v42  ;;  %v640_v52 = vpop.f32.mrb[11].mxu1 }
 0x206   : > { %v659_v54 = vmax.f32 %v550_v47, 0.0  ;;  %v641_v55 = vadd.f32 %v640_v52, %v452_v42 }
 0x207   : > { %v661_v58 = vmax.f32 %v639_v50, 0.0  ;;  %v660_v59 = vmax.f32 %v552_v51, 0.0  ;;  %v555_v60 = vpop.f32.mrb[12].mxu0 }
 0x208   : > { %v1538_v62 = vpack.c.bf16 %v659_v54, %v655_v53  ;;  %v662_v63 = vmax.f32 %v641_v55, 0.0  ;;  %v644_v1 = vpop.f32.mrb[12].mxu1  ;;  %v557_v2 = vpop.f32.mrb[13].mxu0  ;;  %v556_v8 = vadd.f32 %v555_v60, %v457_v3 }
 0x209   : > { %v1546_v4 = vpack.c.bf16 %v661_v58, %v657_v56  ;;  %v1536_v5 = vpack.c.bf16 %v660_v59, %v656_v57  ;;  %v646_v6 = vpop.f32.mrb[13].mxu1  ;;  %v645_v10 = vadd.f32 %v644_v1, %v457_v3  ;;  %v558_v11 = vadd.f32 %v557_v2, %v457_v3 }
 0x20a   : > { %v1544_v7 = vpack.c.bf16 %v662_v63, %v658_v61  ;;  %v647_v13 = vadd.f32 %v646_v6, %v457_v3  ;;  %v663_v20 = vmax.f32 %v556_v8, 0.0 }
 0x20b   : > { %v561_v12 = vpop.f32.mrb[14].mxu0  ;;  %1537 = vmatprep.subr.bf16.mxu0 %v1536_v5  ;;  %v665_v23 = vmax.f32 %v645_v10, 0.0  ;;  %v664_v24 = vmax.f32 %v558_v11, 0.0  ;;  %v699_v10 = vpop.permute.xlu1 %698 }
 0x20c   : > { %v562_v14 = vadd.f32 %v561_v12, %v462_v9  ;;  %v650_v15 = vpop.f32.mrb[14].mxu1  ;;  %1545 = vmatprep.subr.bf16.mxu1 %v1544_v7  ;;  %v563_v16 = vpop.f32.mrb[15].mxu0  ;;  %1539 = vmatpush1.bf16.msra.mxu0 %v1538_v62  ;;  %v666_v27 = vmax.f32 %v647_v13, 0.0 }
 0x20d   : > { %v651_v17 = vadd.f32 %v650_v15, %v462_v9  ;;  %v564_v18 = vadd.f32 %v563_v16, %v462_v9  ;;  %v652_v19 = vpop.f32.mrb[15].mxu1  ;;  %1547 = vmatpush1.bf16.msra.mxu1 %v1546_v4  ;;  %v694_v4 = vpop.permute.xlu0 %693 }
 0x20e   : > { %v667_v21 = vmax.f32 %v562_v14, 0.0  ;;  %v653_v22 = vadd.f32 %v652_v19, %v462_v9 }
 0x20f   : > { %v669_v25 = vmax.f32 %v651_v17, 0.0  ;;  %v668_v26 = vmax.f32 %v564_v18, 0.0 }
 0x210   : > { %v1542_v28 = vpack.c.bf16 %v667_v21, %v663_v20  ;;  %v670_v29 = vmax.f32 %v653_v22, 0.0 }
 0x211   : > { %v1550_v30 = vpack.c.bf16 %v669_v25, %v665_v23  ;;  %v1540_v31 = vpack.c.bf16 %v668_v26, %v664_v24 }
 0x212   : > { %v1548_v32 = vpack.c.bf16 %v670_v29, %v666_v27 }
 0x213   : > { %1541 = vmatprep.subr.bf16.mxu0 %v1540_v31 }
 0x214   : > { %1549 = vmatprep.subr.bf16.mxu1 %v1548_v32  ;;  %1543 = vmatpush1.bf16.msra.mxu0 %v1542_v28 }
 0x215   : > { %1551 = vmatpush1.bf16.msra.mxu1 %v1550_v30 }
 0x217   : > { %1477 = vmatmul.mubr.msk.f32.vlgmr.msra.gmra.mrb[16].mxu0 %vm464_vm1, %v1469_v33 }
 0x218   : > { %1481 = vmatmul.mubr.msk.f32.vlgmr.msra.gmra.mrb[16].mxu1 %vm464_vm1, %v1469_v33  ;;  %783 = vmatprep.mubr.f32.mxu0 %v1756_v0 }
 0x219   : > { %872 = vmatprep.mubr.f32.mxu1 %v1756_v0 }
 0x21b   : > { %1478 = vmatmul.mubr.msk.f32.gmra.mrb[18].mxu0 %vm464_vm1, %v1470_v34 }
 0x21c   : > { %1482 = vmatmul.mubr.msk.f32.gmra.mrb[18].mxu1 %vm464_vm1, %v1470_v34  ;;  %789 = vmatprep.mubr.f32.mxu0 %v1756_v0  ;;  %v1485_v34 = vld [vmem:[%s2114_s1 + $0x60] sm:$0xff] }
 0x21d   : > { %878 = vmatprep.mubr.f32.mxu1 %v1756_v0 }
 0x21f   : > { %1479 = vmatmul.mubr.msk.f32.gmra.mrb[20].mxu0 %vm464_vm1, %v1471_v35 }
 0x220   : > { %1483 = vmatmul.mubr.msk.f32.gmra.mrb[20].mxu1 %vm464_vm1, %v1471_v35  ;;  %795 = vmatprep.mubr.f32.mxu0 %v1756_v0  ;;  %v1486_v35 = vld [vmem:[%s2114_s1 + $0x68] sm:$0xff] }
 0x221   : > { %884 = vmatprep.mubr.f32.mxu1 %v1756_v0 }
 0x223   : > { %1480 = vmatmul.mubr.msk.f32.gmra.mrb[22].mxu0 %vm464_vm1, %v1472_v36 }
 0x224   : > { %1484 = vmatmul.mubr.msk.f32.gmra.mrb[22].mxu1 %vm464_vm1, %v1472_v36  ;;  %1013 = vmatprep.mubr.f32.mxu0 %v1756_v0  ;;  %v1487_v36 = vld [vmem:[%s2114_s1 + $0x70] sm:$0xff] }
 0x225   : > { %1102 = vmatprep.mubr.f32.mxu1 %v1756_v0 }
 0x2ea   : > { %v779_v37 = vpop.f32.mrb[16].mxu0 }
 0x2eb   : > { %v868_v38 = vpop.f32.mrb[16].mxu1  ;;  %v781_v39 = vpop.f32.mrb[17].mxu0  ;;  %v780_v42 = vadd.f32 %v779_v37, %v684_v40  ;;  %v1488_v37 = vld [vmem:[%s2114_s1 + $0x78] sm:$0xff] }
 0x2ec   : > { %v870_v41 = vpop.f32.mrb[17].mxu1  ;;  %v869_v44 = vadd.f32 %v868_v38, %v684_v40  ;;  %v782_v45 = vadd.f32 %v781_v39, %v684_v40 }
 0x2ed   : > { %v871_v47 = vadd.f32 %v870_v41, %v684_v40  ;;  %v891_v54 = vmax.f32 %v780_v42, 0.0  ;;  %v920_v41 = vpop.permute.xlu0 %919 }
 0x2ee   : > { %v785_v46 = vpop.f32.mrb[18].mxu0  ;;  %v893_v57 = vmax.f32 %v869_v44, 0.0  ;;  %v892_v58 = vmax.f32 %v782_v45, 0.0  ;;  %v925_v44 = vpop.permute.xlu1 %924 }
 0x2ef   : > { %v786_v48 = vadd.f32 %v785_v46, %v689_v43  ;;  %v874_v49 = vpop.f32.mrb[18].mxu1  ;;  %v787_v50 = vpop.f32.mrb[19].mxu0  ;;  %v894_v62 = vmax.f32 %v871_v47, 0.0 }
 0x2f0   : > { %v875_v51 = vadd.f32 %v874_v49, %v689_v43  ;;  %v788_v52 = vadd.f32 %v787_v50, %v689_v43  ;;  %v876_v53 = vpop.f32.mrb[19].mxu1 }
 0x2f1   : > { %v895_v55 = vmax.f32 %v786_v48, 0.0  ;;  %v877_v56 = vadd.f32 %v876_v53, %v689_v43 }
 0x2f2   : > { %v897_v59 = vmax.f32 %v875_v51, 0.0  ;;  %v896_v60 = vmax.f32 %v788_v52, 0.0  ;;  %v791_v61 = vpop.f32.mrb[20].mxu0 }
 0x2f3   : > { %v1554_v63 = vpack.c.bf16 %v895_v55, %v891_v54  ;;  %v898_v1 = vmax.f32 %v877_v56, 0.0  ;;  %v880_v2 = vpop.f32.mrb[20].mxu1  ;;  %v793_v3 = vpop.f32.mrb[21].mxu0  ;;  %v792_v9 = vadd.f32 %v791_v61, %v694_v4 }
 0x2f4   : > { %v1562_v5 = vpack.c.bf16 %v897_v59, %v893_v57  ;;  %v1552_v6 = vpack.c.bf16 %v896_v60, %v892_v58  ;;  %v882_v7 = vpop.f32.mrb[21].mxu1  ;;  %v881_v11 = vadd.f32 %v880_v2, %v694_v4  ;;  %v794_v12 = vadd.f32 %v793_v3, %v694_v4 }
 0x2f5   : > { %v1560_v8 = vpack.c.bf16 %v898_v1, %v894_v62  ;;  %v883_v14 = vadd.f32 %v882_v7, %v694_v4  ;;  %v899_v21 = vmax.f32 %v792_v9, 0.0  ;;  %v930_v4 = vpop.permute.xlu0 %929 }
 0x2f6   : > { %v797_v13 = vpop.f32.mrb[22].mxu0  ;;  %1553 = vmatprep.subr.bf16.mxu0 %v1552_v6  ;;  %v901_v24 = vmax.f32 %v881_v11, 0.0  ;;  %v900_v25 = vmax.f32 %v794_v12, 0.0 }
 0x2f7   : > { %v798_v15 = vadd.f32 %v797_v13, %v699_v10  ;;  %v886_v16 = vpop.f32.mrb[22].mxu1  ;;  %1561 = vmatprep.subr.bf16.mxu1 %v1560_v8  ;;  %v799_v17 = vpop.f32.mrb[23].mxu0  ;;  %1555 = vmatpush1.bf16.msra.mxu0 %v1554_v63  ;;  %v902_v28 = vmax.f32 %v883_v14, 0.0 }
 0x2f8   : > { %v887_v18 = vadd.f32 %v886_v16, %v699_v10  ;;  %v800_v19 = vadd.f32 %v799_v17, %v699_v10  ;;  %v888_v20 = vpop.f32.mrb[23].mxu1  ;;  %1563 = vmatpush1.bf16.msra.mxu1 %v1562_v5 }
 0x2f9   : > { %v903_v22 = vmax.f32 %v798_v15, 0.0  ;;  %v889_v23 = vadd.f32 %v888_v20, %v699_v10  ;;  %v935_v10 = vpop.permute.xlu1 %934 }
 0x2fa   : > { %v905_v26 = vmax.f32 %v887_v18, 0.0  ;;  %v904_v27 = vmax.f32 %v800_v19, 0.0 }
 0x2fb   : > { %v1558_v29 = vpack.c.bf16 %v903_v22, %v899_v21  ;;  %v906_v30 = vmax.f32 %v889_v23, 0.0 }
 0x2fc   : > { %v1566_v31 = vpack.c.bf16 %v905_v26, %v901_v24  ;;  %v1556_v32 = vpack.c.bf16 %v904_v27, %v900_v25 }
 0x2fd   : > { %v1564_v33 = vpack.c.bf16 %v906_v30, %v902_v28 }
 0x2fe   : > { %1557 = vmatprep.subr.bf16.mxu0 %v1556_v32 }
 0x2ff   : > { %1565 = vmatprep.subr.bf16.mxu1 %v1564_v33  ;;  %1559 = vmatpush1.bf16.msra.mxu0 %v1558_v29 }
 0x300   : > { %1567 = vmatpush1.bf16.msra.mxu1 %v1566_v31 }
 0x302   : > { %1493 = vmatmul.mubr.msk.f32.vlgmr.msra.gmra.mrb[24].mxu0 %vm464_vm1, %v1485_v34 }
 0x303   : > { %1497 = vmatmul.mubr.msk.f32.vlgmr.msra.gmra.mrb[24].mxu1 %vm464_vm1, %v1485_v34  ;;  %1019 = vmatprep.mubr.f32.mxu0 %v1756_v0  ;;  %v1501_v34 = vld [vmem:[%s2114_s1 + $0x80] sm:$0xff] }
 0x304   : > { %1108 = vmatprep.mubr.f32.mxu1 %v1756_v0 }
 0x306   : > { %1494 = vmatmul.mubr.msk.f32.gmra.mrb[26].mxu0 %vm464_vm1, %v1486_v35 }
 0x307   : > { %1498 = vmatmul.mubr.msk.f32.gmra.mrb[26].mxu1 %vm464_vm1, %v1486_v35  ;;  %1025 = vmatprep.mubr.f32.mxu0 %v1756_v0  ;;  %v1150_v35 = vpop.permute.xlu0 %1149 }
 0x308   : > { %1114 = vmatprep.mubr.f32.mxu1 %v1756_v0 }
 0x30a   : > { %1495 = vmatmul.mubr.msk.f32.gmra.mrb[28].mxu0 %vm464_vm1, %v1487_v36 }
 0x30b   : > { %1499 = vmatmul.mubr.msk.f32.gmra.mrb[28].mxu1 %vm464_vm1, %v1487_v36  ;;  %1031 = vmatprep.mubr.f32.mxu0 %v1756_v0 }
 0x30c   : > { %1120 = vmatprep.mubr.f32.mxu1 %v1756_v0 }
 0x30e   : > { %1496 = vmatmul.mubr.msk.f32.gmra.mrb[30].mxu0 %vm464_vm1, %v1488_v37 }
 0x30f   : > { %1500 = vmatmul.mubr.msk.f32.gmra.mrb[30].mxu1 %vm464_vm1, %v1488_v37  ;;  %1219 = vmatprep.mubr.f32.mxu0 %v1756_v0 }
 0x310   : > { %1290 = vmatprep.mubr.f32.mxu1 %v1756_v0 }
 0x3d5   : > { %v1015_v38 = vpop.f32.mrb[24].mxu0 }
 0x3d6   : > { %v1104_v39 = vpop.f32.mrb[24].mxu1  ;;  %v1017_v40 = vpop.f32.mrb[25].mxu0  ;;  %v1016_v43 = vadd.f32 %v1015_v38, %v920_v41 }
 0x3d7   : > { %v1106_v42 = vpop.f32.mrb[25].mxu1  ;;  %v1105_v45 = vadd.f32 %v1104_v39, %v920_v41  ;;  %v1018_v46 = vadd.f32 %v1017_v40, %v920_v41 }
 0x3d8   : > { %v1107_v48 = vadd.f32 %v1106_v42, %v920_v41  ;;  %v1127_v55 = vmax.f32 %v1016_v43, 0.0 }
 0x3d9   : > { %v1021_v47 = vpop.f32.mrb[26].mxu0  ;;  %v1129_v57 = vmax.f32 %v1105_v45, 0.0  ;;  %v1128_v58 = vmax.f32 %v1018_v46, 0.0 }
 0x3da   : > { %v1022_v49 = vadd.f32 %v1021_v47, %v925_v44  ;;  %v1110_v50 = vpop.f32.mrb[26].mxu1  ;;  %v1023_v51 = vpop.f32.mrb[27].mxu0  ;;  %v1130_v62 = vmax.f32 %v1107_v48, 0.0 }
 0x3db   : > { %v1111_v52 = vadd.f32 %v1110_v50, %v925_v44  ;;  %v1024_v53 = vadd.f32 %v1023_v51, %v925_v44  ;;  %v1112_v54 = vpop.f32.mrb[27].mxu1 }
 0x3dc   : > { %v1131_v56 = vmax.f32 %v1022_v49, 0.0  ;;  %v1113_v0 = vadd.f32 %v1112_v54, %v925_v44 }
 0x3dd   : > { %v1133_v59 = vmax.f32 %v1111_v52, 0.0  ;;  %v1132_v60 = vmax.f32 %v1024_v53, 0.0  ;;  %v1027_v61 = vpop.f32.mrb[28].mxu0 }
 0x3de   : > { %v1570_v63 = vpack.c.bf16 %v1131_v56, %v1127_v55  ;;  %v1134_v1 = vmax.f32 %v1113_v0, 0.0  ;;  %v1116_v2 = vpop.f32.mrb[28].mxu1  ;;  %v1029_v3 = vpop.f32.mrb[29].mxu0  ;;  %v1028_v9 = vadd.f32 %v1027_v61, %v930_v4  ;;  %v1326_v61 = vlaneseq }
 0x3df   : > { %v1578_v5 = vpack.c.bf16 %v1133_v59, %v1129_v57  ;;  %v1568_v6 = vpack.c.bf16 %v1132_v60, %v1128_v58  ;;  %v1118_v7 = vpop.f32.mrb[29].mxu1  ;;  %v1117_v11 = vadd.f32 %v1116_v2, %v930_v4  ;;  %v1030_v12 = vadd.f32 %v1029_v3, %v930_v4 }
 0x3e0   : > { %v1576_v8 = vpack.c.bf16 %v1134_v1, %v1130_v62  ;;  %v1119_v14 = vadd.f32 %v1118_v7, %v930_v4  ;;  %v1135_v21 = vmax.f32 %v1028_v9, 0.0  ;;  %v1758_v59 = vmov 1966171168  }
 0x3e1   : > { %v1033_v13 = vpop.f32.mrb[30].mxu0  ;;  %1569 = vmatprep.subr.bf16.mxu0 %v1568_v6  ;;  %v1137_v24 = vmax.f32 %v1117_v11, 0.0  ;;  %v1136_v25 = vmax.f32 %v1030_v12, 0.0  ;;  %v1324_v60 = vunpack.c.l.s4 %v1758_v59  ;;  %vm1348_vm2 = vcmp.lt.s32.totalorder %v1326_v61, 512 }
 0x3e2   : > { %v1034_v15 = vadd.f32 %v1033_v13, %v935_v10  ;;  %v1122_v16 = vpop.f32.mrb[30].mxu1  ;;  %1577 = vmatprep.subr.bf16.mxu1 %v1576_v8  ;;  %v1035_v17 = vpop.f32.mrb[31].mxu0  ;;  %1571 = vmatpush1.bf16.msra.mxu0 %v1570_v63  ;;  %v1138_v28 = vmax.f32 %v1119_v14, 0.0  ;;  %v1327_v63 = vshrl.u32 %v1326_v61, 7 }
 0x3e3   : > { %v1123_v18 = vadd.f32 %v1122_v16, %v935_v10  ;;  %v1036_v19 = vadd.f32 %v1035_v17, %v935_v10  ;;  %v1124_v20 = vpop.f32.mrb[31].mxu1  ;;  %1579 = vmatpush1.bf16.msra.mxu1 %v1578_v5  ;;  %v1325_v62 = vunpack.c.0.s8 %v1324_v60 }
 0x3e4   : > { %v1139_v22 = vmax.f32 %v1034_v15, 0.0  ;;  %v1125_v23 = vadd.f32 %v1124_v20, %v935_v10 }
 0x3e5   : > { %v1141_v26 = vmax.f32 %v1123_v18, 0.0  ;;  %v1140_v27 = vmax.f32 %v1036_v19, 0.0  ;;  %v1328_v3 = vsub.s32 %v1325_v62, %v1327_v63 }
 0x3e6   : > { %v1574_v29 = vpack.c.bf16 %v1139_v22, %v1135_v21  ;;  %v1142_v30 = vmax.f32 %v1125_v23, 0.0 }
 0x3e7   : > { %v1582_v31 = vpack.c.bf16 %v1141_v26, %v1137_v24  ;;  %v1572_v32 = vpack.c.bf16 %v1140_v27, %v1136_v25 }
 0x3e8   : > { %v1580_v33 = vpack.c.bf16 %v1142_v30, %v1138_v28 }
 0x3e9   : > { %1573 = vmatprep.subr.bf16.mxu0 %v1572_v32 }
 0x3ea   : > { %1581 = vmatprep.subr.bf16.mxu1 %v1580_v33  ;;  %1575 = vmatpush1.bf16.msra.mxu0 %v1574_v29 }
 0x3eb   : > { %1583 = vmatpush1.bf16.msra.mxu1 %v1582_v31 }
 0x3ed   : > { %1503 = vmatmul.mubr.msk.f32.vlgmr.msra.gmra.mrb[32].mxu0 %vm464_vm1, %v1501_v34 }
 0x3ee   : > { %1504 = vmatmul.mubr.msk.f32.vlgmr.msra.gmra.mrb[32].mxu1 %vm464_vm1, %v1501_v34 }
 0x4c0   : > { %v1221_v36 = vpop.f32.mrb[32].mxu0 }
 0x4c1   : > { %v1222_v37 = vadd.f32 %v1221_v36, %v1150_v35  ;;  %v1292_v38 = vpop.f32.mrb[32].mxu1  ;;  %v1223_v39 = vpop.f32.mrb[33].mxu0 }
 0x4c2   : > { %v1293_v40 = vadd.f32 %v1292_v38, %v1150_v35  ;;  %v1224_v41 = vadd.f32 %v1223_v39, %v1150_v35  ;;  %v1294_v42 = vpop.f32.mrb[33].mxu1 }
 0x4c3   : > { %v1297_v43 = vsub.f32 0.0, %v1222_v37  ;;  %v1295_v44 = vadd.f32 %v1294_v42, %v1150_v35 }
 0x4c4   : > { %v1299_v45 = vsub.f32 0.0, %v1293_v40  ;;  %v1298_v46 = vsub.f32 0.0, %v1224_v41 }
 0x4c5   : > { %v1301_v47 = vmul.f32 1.442695, %v1297_v43  ;;  %v1300_v48 = vsub.f32 0.0, %v1295_v44 }
 0x4c6   : > { %v1305_v49 = vmul.f32 1.442695, %v1299_v45  ;;  %v1303_v50 = vmul.f32 1.442695, %v1298_v46 }
 0x4c7   : > { %1638 = vpow2.f32 %v1301_v47  ;;  %v1307_v51 = vmul.f32 1.442695, %v1300_v48 }
 0x4c8   : > { %1640 = vpow2.f32 %v1305_v49 }
 0x4c9   : > { %1642 = vpow2.f32 %v1303_v50 }
 0x4ca   : > { %1644 = vpow2.f32 %v1307_v51 }
 0x4d1   : > { %v1639_v52 = vpop.eup %1638 }
 0x4d2   : > { %v1641_v53 = vpop.eup %1640  ;;  %v1309_v54 = vadd.f32 1.0, %v1639_v52 }
 0x4d3   : > { %v1643_v55 = vpop.eup %1642  ;;  %v1311_v56 = vadd.f32 1.0, %v1641_v53 }
 0x4d4   : > { %v1645_v0 = vpop.eup %1644  ;;  %1646 = vrcp.f32 %v1309_v54  ;;  %v1310_v57 = vadd.f32 1.0, %v1643_v55 }
 0x4d5   : > { %1648 = vrcp.f32 %v1311_v56  ;;  %v1312_v58 = vadd.f32 1.0, %v1645_v0 }
 0x4d6   : > { %1650 = vrcp.f32 %v1310_v57 }
 0x4d7   : > { %1652 = vrcp.f32 %v1312_v58 }
 0x4de   : > { %v1647_v1 = vpop.eup %1646 }
 0x4df   : > { %v1649_v2 = vpop.eup %1648 }
 0x4e0   : > { %v1651_v4 = vpop.eup %1650 }
 0x4e1   : > { %v1653_v5 = vpop.eup %1652  ;;  %v1321_v6 = vcombine.low %v1647_v1, %v1651_v4 }
 0x4e2   : > { %v1322_v7 = vcombine.low %v1649_v2, %v1653_v5 }
 0x4e3   : > { %v1329_v8 = vrot.slane %v1321_v6, %v1328_v3 }
 0x4e4   : > { %v1336_v9 = vrot.slane %v1322_v7, %v1328_v3 }
 0x4e6   : > { %v1337_v10 = vcombine.low %v1329_v8, %v1336_v9 }
 0x4e8   : > { %v1344_v11 = vrot.slane %v1337_v10, %v1328_v3 }
 0x4ea   : > { %1350 = vst.msk [vmem:[%s188_s6] sm:$0xf] %vm1348_vm2, %v1344_v11 }
 0x4eb   : > { %1697 = shalt.err (!%p1694_p3)
}
 0x4ec   : > { %s1698_s9 = scalar_lea.hbm %s2069_s20, 64  ;;  %s1702_s5 = scalar_lea.hbm %s2116_s3, 128 }
 0x4ed   : > { %p1699_p5 = scmp.ne.s32.totalorder %s2069_s20, %s1698_s9  ;;  %p1703_p9 = scmp.lt.u32.totalorder %s2069_s20, %s2116_s3 }
 0x4ee   : > { %p1704_p0 = scmp.lt.u32.totalorder %s1702_s5, %s1698_s9  ;;  %p1706_p6 = scmp.lt.u32.totalorder %s1698_s9, %s2069_s20 }
 0x4ef   : > { %p1700_p7 = pnand %p1699_p5, %p2124_p11 }
 0x4f0   : > { %p1705_p2 = por %p1704_p0, %p1703_p9 }
 0x4f1   : > { %p1701_p8 = pneg %p1700_p7 }
 0x4f2   : > { %p1707_p12 = por %p1706_p6, %p1705_p2 }
 0x4f4   : > { %p1708_p13 = pnand %p1707_p12, %p1701_p8 }
 0x4f6   : > { %1711 = shalt.err (!%p1708_p13)
}
 0x4f7   : > { %1586 = dma.vmem_to_hbm [thread:$0]  (%p2124_p11), %s2071_s7, 64, %s2069_s20, %s1352_s22  }
 0x4f8 PF: > { %s1378_s17 = sand.u32 1, %s1738_s12   ;;  %p2125_p4 = scmp.ne.s32.totalorder %s2121_s25, 0 }
 0x4f9   : > { %p2126_p10 = scmp.ge.s32.totalorder %s1750_s15, 2  ;;  %s1379_s23 = scalar_lea.sflag [#allocation4], %s1378_s17 }
 0x4fb   : > { %p1593_p1 = pnand %p2126_p10, %p2125_p4 }
 0x4fd   : > { %1733 = dma.done.wait (!%p1593_p1), %s1379_s23, 64  }
 0x4fe   : > { %1735 = vsyncadd (!%p1593_p1), %s1379_s23, 4294967232  ;;  %p16_p3 = scmp.ge.s32.totalorder %s1805_s18, 4   ;;  %s2127_s12 = smov %s1742_s13 }
 0x4ff   : > { %s2128_s13 = smov %s1746_s14  ;;  %s2129_s14 = smov %s1817_s21 }
 0x500   : > { %s2130_s15 = smov %s1805_s18  ;;  %18 = sbr.rel (!%p16_p3) target bundleno = 5 (0x5), region = 85 }
 0x507   :  { %1384 = vsyncpa [#allocation3], 1 }
 0x508   :  { %1386 = vsyncpa [#allocation3 + $0x1], 1 }
 0x509   :  { %1387 = vsyncpa [#allocation4], 1 }
 0x50a   :  { %1389 = vsyncpa [#allocation4 + $0x1], 1 }

</bundles_post_ra>
